<compile_context>
chip_gen: v6e
topology: v6e:2x2x1
jax: 0.10.0
libtpu: 0.0.40
codegen_flags: <defaults>
</compile_context>

<pallas_src>
import functools

import jax
import jax.numpy as jnp
from jax.experimental import pallas as pl
from jax.experimental.pallas import tpu as pltpu

# ---- static conv configuration (mirrors the nn.Module __init__) -------------
CIN = 3
COUT = 6
KH = KW = 3


def _round_up(v, m):
    return -(-v // m) * m


def _block_vmem_bytes(bn, hw, ohw):
    """Honest padded-f32 VMEM footprint of one grid block (double-buffered I/O)."""
    rx, lx = _round_up(bn * CIN, 8), _round_up(hw, 128)
    ro, lo = _round_up(bn * COUT, 8), _round_up(ohw, 128)
    rw, lw = _round_up(bn * COUT, 8), _round_up(bn * CIN, 128)
    x_bytes = 2 * rx * lx * 4                 # input block, double buffered
    o_bytes = 2 * ro * lo * 4                 # output block, double buffered
    w_bytes = 2 * KH * KW * rw * lw * 4       # per-tap block-diag weights
    b_bytes = 2 * ro * 128 * 4                # bias column
    live = rx * lx * 4 + ro * lx * 4          # loaded x + f32 accumulator
    return x_bytes + o_bytes + w_bytes + b_bytes + live


def _default_batch_splits():
    # Only v7x has 2 TensorCores per chip; on v5e/v6e the grid is a serial loop,
    # so splitting just shrinks DMAs for zero parallelism gain.
    try:
        kind = jax.devices()[0].device_kind.lower()
    except Exception:
        return 1
    return 2 if "v7" in kind else 1


def _conv_tap_matmul_kernel(x_ref, w9_ref, b_ref, o_ref, *, img_w, ohw):
    """One batch block per grid step.

    x_ref : (bn*CIN,  H*W)          f32 flattened images (image-major rows)
    w9_ref: (9, bn*COUT, bn*CIN)    f32 block-diagonal per-tap weights
    b_ref : (bn*COUT, 1)            f32 per-output-row bias
    o_ref : (bn*COUT, OH*W)         valid rows only; columns cropped by wrapper
    """
    x = x_ref[...]                  # already f32
    hw = x.shape[-1]

    acc = None
    for kh in range(KH):
        for kw in range(KW):
            s = kh * img_w + kw
            # out[q] needs x[q + s]; pltpu.roll follows jnp.roll, so shift HW - s.
            xs = x if s == 0 else pltpu.roll(x, shift=hw - s, axis=1)
            tap = jnp.dot(w9_ref[kh * KW + kw], xs,
                          preferred_element_type=jnp.float32)
            acc = tap if acc is None else acc + tap

    # Keep only the OH*W valid rows; add bias as a single broadcast VPU add.
    o_ref[...] = (acc[:, :ohw] + b_ref[...]).astype(o_ref.dtype)


def tudui_forward(x, weight, bias, *, vmem_budget_bytes=40 << 20,
                  batch_splits=None):
    """x: (N, 3, H, W); weight: (6, 3, 3, 3); bias: (6,). Returns (N, 6, H-2, W-2)."""
    n, cin, h, w = x.shape
    assert cin == CIN and h >= KH and w >= KW
    oh, ow = h - KH + 1, w - KW + 1
    hw, ohw = h * w, oh * w

    # --- wrapper-side layout plumbing (pure reshapes, no padding copies) -----
    x_rows = x.astype(jnp.float32).reshape(n * CIN, hw)

    # --- batch block size: VMEM-capped, sublane-aligned, v7x-only split ------
    splits = _default_batch_splits() if batch_splits is None else batch_splits
    # 32-image cap: the block-diagonal tap matmul does ~bn^2 MXU work, keep the
    # kernel firmly HBM-bound rather than trading into MXU passes.
    bn = min(n, pl.cdiv(n, max(1, splits)), 32)
    while bn > 8 and _block_vmem_bytes(bn, hw, ohw) > vmem_budget_bytes:
        bn -= 8
    if bn < n:
        # Non-full blocks must keep bn*CIN / bn*COUT rows sublane-aligned
        # ((8,128) rule).  The last (partial) block may run past N*CIN rows:
        # Pallas pads that read and drops the out-of-range output rows, and the
        # block-diagonal weights keep valid images independent of junk rows.
        bn = min(n, max(8, (bn // 8) * 8))
    # TODO(synk): very large images (e.g. 512x512 on v7x's 64 MiB/TC VMEM) would
    # also need a second grid axis over H*W with a (KH-1)*W + (KW-1) lane halo.
    grid = (pl.cdiv(n, bn),)

    need = _block_vmem_bytes(bn, hw, ohw)
    vmem_limit = int(min(max(need + (8 << 20), 32 << 20), 56 << 20))

    # --- weights: block-diagonal per spatial tap, bias tiled per output row --
    # w_taps[t, o, c] = weight[o, c, kh, kw] with t = kh*KW + kw
    w_taps = jnp.transpose(weight, (2, 3, 0, 1)).reshape(
        KH * KW, COUT, CIN).astype(jnp.float32)
    eye_b = jnp.eye(bn, dtype=jnp.float32)
    # w9[t, b*COUT + o, d*CIN + c] = w_taps[t, o, c] * (b == d)
    w9 = jnp.einsum("toc,bd->tbodc", w_taps, eye_b).reshape(
        KH * KW, bn * COUT, bn * CIN)
    bias_rows = jnp.tile(bias.astype(jnp.float32), bn).reshape(bn * COUT, 1)

    kernel = functools.partial(_conv_tap_matmul_kernel, img_w=w, ohw=ohw)
    out2d = pl.pallas_call(
        kernel,
        out_shape=jax.ShapeDtypeStruct((n * COUT, ohw), x.dtype),
        grid_spec=pltpu.PrefetchScalarGridSpec(
            num_scalar_prefetch=0,
            grid=grid,
            in_specs=[
                pl.BlockSpec((bn * CIN, hw), lambda i: (i, 0)),
                pl.BlockSpec((KH * KW, bn * COUT, bn * CIN),
                             lambda i: (0, 0, 0)),
                pl.BlockSpec((bn * COUT, 1), lambda i: (0, 0)),
            ],
            out_specs=pl.BlockSpec((bn * COUT, ohw), lambda i: (i, 0)),
        ),
        compiler_params=pltpu.CompilerParams(
            dimension_semantics=("parallel",),
            vmem_limit_bytes=vmem_limit,
        ),
    )(x_rows, w9, bias_rows)

    # Un-flatten and crop only the W -> OW columns (rows are already valid).
    return out2d.reshape(n, COUT, oh, w)[:, :, :, :ow]


if __name__ == "__main__":
    key = jax.random.PRNGKey(0)
    kx, kw_, kb = jax.random.split(key, 3)

    # Small deterministic shapes consistent with the module (Cin must be 3).
    N, H, W = 2, 16, 16
    x = jax.random.normal(kx, (N, CIN, H, W), dtype=jnp.float32)

    # Deterministic parameter init (PyTorch-default-like uniform bound).
    fan_in = CIN * KH * KW
    bound = float(1.0 / (fan_in ** 0.5))
    weight = jax.random.uniform(kw_, (COUT, CIN, KH, KW), jnp.float32,
                                minval=-bound, maxval=bound)
    bias = jax.random.uniform(kb, (COUT,), jnp.float32,
                              minval=-bound, maxval=bound)

    out = jax.block_until_ready(tudui_forward(x, weight, bias))

    # Reference check against XLA's conv (NCHW / OIHW, VALID padding).
    ref = jax.lax.conv_general_dilated(
        x, weight, window_strides=(1, 1), padding="VALID",
        dimension_numbers=("NCHW", "OIHW", "NCHW")) + bias.reshape(1, COUT, 1, 1)
    assert out.shape == (N, COUT, H - 2, W - 2)
    assert jnp.allclose(out, ref, atol=1e-4, rtol=1e-4)

    print("KERNEL_OK")
</pallas_src>

<mosaic_0001>
module attributes {stable_mosaic.version = 11 : i64} {
  func.func @_conv_tap_matmul_kernel(%arg0: i32, %arg1: memref<6x256xf32, #tpu.memory_space<vmem>>, %arg2: memref<9x12x6xf32, #tpu.memory_space<vmem>>, %arg3: memref<12x1xf32, #tpu.memory_space<vmem>>, %arg4: memref<12x224xf32, #tpu.memory_space<vmem>>) attributes {dimension_semantics = [#tpu.dimension_semantics<parallel>], iteration_bounds = array<i64: 1>, scalar_prefetch = 0 : i64, scratch_operands = 0 : i64, tpu.core_type = #tpu.core_type<tc>, window_params = [{transform_indices = @transform_0, window_bounds = array<i64: 6, 256>}, {pipeline_mode = #tpu.pipeline_mode<synchronous>, transform_indices = @transform_1, window_bounds = array<i64: 9, 12, 6>}, {pipeline_mode = #tpu.pipeline_mode<synchronous>, transform_indices = @transform_2, window_bounds = array<i64: 12, 1>}, {transform_indices = @transform_3, window_bounds = array<i64: 12, 224>}]} {
    %c0 = arith.constant 0 : index
    %c0_0 = arith.constant 0 : index
    %0 = vector.load %arg1[%c0, %c0_0] : memref<6x256xf32, #tpu.memory_space<vmem>>, vector<6x256xf32>
    %c0_1 = arith.constant 0 : index
    %c0_2 = arith.constant 0 : index
    %c0_3 = arith.constant 0 : index
    %1 = vector.load %arg2[%c0_1, %c0_2, %c0_3] : memref<9x12x6xf32, #tpu.memory_space<vmem>>, vector<1x12x6xf32>
    %2 = vector.shape_cast %1 : vector<1x12x6xf32> to vector<12x6xf32>
    %cst = arith.constant dense<0.000000e+00> : vector<12x256xf32>
    %3 = tpu.matmul %2, %0, %cst {dimension_numbers = #tpu.dot_dimension_numbers<[1], [0], [0], [1], [0, 0, 1, 1], [], []>} : vector<12x6xf32>, vector<6x256xf32>, vector<12x256xf32> -> vector<12x256xf32>
    %c255_i32 = arith.constant 255 : i32
    %4 = tpu.dynamic_rotate %0 by %c255_i32 dim 1 : vector<6x256xf32>, i32 -> vector<6x256xf32>
    %c1 = arith.constant 1 : index
    %c0_4 = arith.constant 0 : index
    %c0_5 = arith.constant 0 : index
    %5 = vector.load %arg2[%c1, %c0_4, %c0_5] : memref<9x12x6xf32, #tpu.memory_space<vmem>>, vector<1x12x6xf32>
    %6 = vector.shape_cast %5 : vector<1x12x6xf32> to vector<12x6xf32>
    %cst_6 = arith.constant dense<0.000000e+00> : vector<12x256xf32>
    %7 = tpu.matmul %6, %4, %cst_6 {dimension_numbers = #tpu.dot_dimension_numbers<[1], [0], [0], [1], [0, 0, 1, 1], [], []>} : vector<12x6xf32>, vector<6x256xf32>, vector<12x256xf32> -> vector<12x256xf32>
    %8 = arith.addf %3, %7 : vector<12x256xf32>
    %c254_i32 = arith.constant 254 : i32
    %9 = tpu.dynamic_rotate %0 by %c254_i32 dim 1 : vector<6x256xf32>, i32 -> vector<6x256xf32>
    %c2 = arith.constant 2 : index
    %c0_7 = arith.constant 0 : index
    %c0_8 = arith.constant 0 : index
    %10 = vector.load %arg2[%c2, %c0_7, %c0_8] : memref<9x12x6xf32, #tpu.memory_space<vmem>>, vector<1x12x6xf32>
    %11 = vector.shape_cast %10 : vector<1x12x6xf32> to vector<12x6xf32>
    %cst_9 = arith.constant dense<0.000000e+00> : vector<12x256xf32>
    %12 = tpu.matmul %11, %9, %cst_9 {dimension_numbers = #tpu.dot_dimension_numbers<[1], [0], [0], [1], [0, 0, 1, 1], [], []>} : vector<12x6xf32>, vector<6x256xf32>, vector<12x256xf32> -> vector<12x256xf32>
    %13 = arith.addf %8, %12 : vector<12x256xf32>
    %c240_i32 = arith.constant 240 : i32
    %14 = tpu.dynamic_rotate %0 by %c240_i32 dim 1 : vector<6x256xf32>, i32 -> vector<6x256xf32>
    %c3 = arith.constant 3 : index
    %c0_10 = arith.constant 0 : index
    %c0_11 = arith.constant 0 : index
    %15 = vector.load %arg2[%c3, %c0_10, %c0_11] : memref<9x12x6xf32, #tpu.memory_space<vmem>>, vector<1x12x6xf32>
    %16 = vector.shape_cast %15 : vector<1x12x6xf32> to vector<12x6xf32>
    %cst_12 = arith.constant dense<0.000000e+00> : vector<12x256xf32>
    %17 = tpu.matmul %16, %14, %cst_12 {dimension_numbers = #tpu.dot_dimension_numbers<[1], [0], [0], [1], [0, 0, 1, 1], [], []>} : vector<12x6xf32>, vector<6x256xf32>, vector<12x256xf32> -> vector<12x256xf32>
    %18 = arith.addf %13, %17 : vector<12x256xf32>
    %c239_i32 = arith.constant 239 : i32
    %19 = tpu.dynamic_rotate %0 by %c239_i32 dim 1 : vector<6x256xf32>, i32 -> vector<6x256xf32>
    %c4 = arith.constant 4 : index
    %c0_13 = arith.constant 0 : index
    %c0_14 = arith.constant 0 : index
    %20 = vector.load %arg2[%c4, %c0_13, %c0_14] : memref<9x12x6xf32, #tpu.memory_space<vmem>>, vector<1x12x6xf32>
    %21 = vector.shape_cast %20 : vector<1x12x6xf32> to vector<12x6xf32>
    %cst_15 = arith.constant dense<0.000000e+00> : vector<12x256xf32>
    %22 = tpu.matmul %21, %19, %cst_15 {dimension_numbers = #tpu.dot_dimension_numbers<[1], [0], [0], [1], [0, 0, 1, 1], [], []>} : vector<12x6xf32>, vector<6x256xf32>, vector<12x256xf32> -> vector<12x256xf32>
    %23 = arith.addf %18, %22 : vector<12x256xf32>
    %c238_i32 = arith.constant 238 : i32
    %24 = tpu.dynamic_rotate %0 by %c238_i32 dim 1 : vector<6x256xf32>, i32 -> vector<6x256xf32>
    %c5 = arith.constant 5 : index
    %c0_16 = arith.constant 0 : index
    %c0_17 = arith.constant 0 : index
    %25 = vector.load %arg2[%c5, %c0_16, %c0_17] : memref<9x12x6xf32, #tpu.memory_space<vmem>>, vector<1x12x6xf32>
    %26 = vector.shape_cast %25 : vector<1x12x6xf32> to vector<12x6xf32>
    %cst_18 = arith.constant dense<0.000000e+00> : vector<12x256xf32>
    %27 = tpu.matmul %26, %24, %cst_18 {dimension_numbers = #tpu.dot_dimension_numbers<[1], [0], [0], [1], [0, 0, 1, 1], [], []>} : vector<12x6xf32>, vector<6x256xf32>, vector<12x256xf32> -> vector<12x256xf32>
    %28 = arith.addf %23, %27 : vector<12x256xf32>
    %c224_i32 = arith.constant 224 : i32
    %29 = tpu.dynamic_rotate %0 by %c224_i32 dim 1 : vector<6x256xf32>, i32 -> vector<6x256xf32>
    %c6 = arith.constant 6 : index
    %c0_19 = arith.constant 0 : index
    %c0_20 = arith.constant 0 : index
    %30 = vector.load %arg2[%c6, %c0_19, %c0_20] : memref<9x12x6xf32, #tpu.memory_space<vmem>>, vector<1x12x6xf32>
    %31 = vector.shape_cast %30 : vector<1x12x6xf32> to vector<12x6xf32>
    %cst_21 = arith.constant dense<0.000000e+00> : vector<12x256xf32>
    %32 = tpu.matmul %31, %29, %cst_21 {dimension_numbers = #tpu.dot_dimension_numbers<[1], [0], [0], [1], [0, 0, 1, 1], [], []>} : vector<12x6xf32>, vector<6x256xf32>, vector<12x256xf32> -> vector<12x256xf32>
    %33 = arith.addf %28, %32 : vector<12x256xf32>
    %c223_i32 = arith.constant 223 : i32
    %34 = tpu.dynamic_rotate %0 by %c223_i32 dim 1 : vector<6x256xf32>, i32 -> vector<6x256xf32>
    %c7 = arith.constant 7 : index
    %c0_22 = arith.constant 0 : index
    %c0_23 = arith.constant 0 : index
    %35 = vector.load %arg2[%c7, %c0_22, %c0_23] : memref<9x12x6xf32, #tpu.memory_space<vmem>>, vector<1x12x6xf32>
    %36 = vector.shape_cast %35 : vector<1x12x6xf32> to vector<12x6xf32>
    %cst_24 = arith.constant dense<0.000000e+00> : vector<12x256xf32>
    %37 = tpu.matmul %36, %34, %cst_24 {dimension_numbers = #tpu.dot_dimension_numbers<[1], [0], [0], [1], [0, 0, 1, 1], [], []>} : vector<12x6xf32>, vector<6x256xf32>, vector<12x256xf32> -> vector<12x256xf32>
    %38 = arith.addf %33, %37 : vector<12x256xf32>
    %c222_i32 = arith.constant 222 : i32
    %39 = tpu.dynamic_rotate %0 by %c222_i32 dim 1 : vector<6x256xf32>, i32 -> vector<6x256xf32>
    %c8 = arith.constant 8 : index
    %c0_25 = arith.constant 0 : index
    %c0_26 = arith.constant 0 : index
    %40 = vector.load %arg2[%c8, %c0_25, %c0_26] : memref<9x12x6xf32, #tpu.memory_space<vmem>>, vector<1x12x6xf32>
    %41 = vector.shape_cast %40 : vector<1x12x6xf32> to vector<12x6xf32>
    %cst_27 = arith.constant dense<0.000000e+00> : vector<12x256xf32>
    %42 = tpu.matmul %41, %39, %cst_27 {dimension_numbers = #tpu.dot_dimension_numbers<[1], [0], [0], [1], [0, 0, 1, 1], [], []>} : vector<12x6xf32>, vector<6x256xf32>, vector<12x256xf32> -> vector<12x256xf32>
    %43 = arith.addf %38, %42 : vector<12x256xf32>
    %44 = vector.extract_strided_slice %43 {offsets = [0, 0], sizes = [12, 224], strides = [1, 1]} : vector<12x256xf32> to vector<12x224xf32>
    %c0_28 = arith.constant 0 : index
    %c0_29 = arith.constant 0 : index
    %45 = vector.load %arg3[%c0_28, %c0_29] : memref<12x1xf32, #tpu.memory_space<vmem>>, vector<12x1xf32>
    %46 = vector.broadcast %45 : vector<12x1xf32> to vector<12x224xf32>
    %47 = arith.addf %44, %46 : vector<12x224xf32>
    %c0_30 = arith.constant 0 : index
    %c0_31 = arith.constant 0 : index
    %48 = vector.load %arg4[%c0_30, %c0_31] : memref<12x224xf32, #tpu.memory_space<vmem>>, vector<12x224xf32>
    tpu.vector_store %arg4[%c0_30, %c0_31], %47 {strides = array<i32>} : memref<12x224xf32, #tpu.memory_space<vmem>>, vector<12x224xf32>,
    return
  }
  func.func @transform_0(%arg0: i32) -> (i32, i32) {
    %c0_i32 = arith.constant 0 : i32
    %c0_i32_0 = arith.constant 0 : i32
    return %arg0, %c0_i32 : i32, i32
  }
  func.func @transform_1(%arg0: i32) -> (i32, i32, i32) {
    %c0_i32 = arith.constant 0 : i32
    %c0_i32_0 = arith.constant 0 : i32
    %c0_i32_1 = arith.constant 0 : i32
    %c0_i32_2 = arith.constant 0 : i32
    return %c0_i32, %c0_i32_0, %c0_i32_1 : i32, i32, i32
  }
  func.func @transform_2(%arg0: i32) -> (i32, i32) {
    %c0_i32 = arith.constant 0 : i32
    %c0_i32_0 = arith.constant 0 : i32
    %c0_i32_1 = arith.constant 0 : i32
    return %c0_i32, %c0_i32_0 : i32, i32
  }
  func.func @transform_3(%arg0: i32) -> (i32, i32) {
    %c0_i32 = arith.constant 0 : i32
    %c0_i32_0 = arith.constant 0 : i32
    return %arg0, %c0_i32 : i32, i32
  }
}

</mosaic_0001>

<bundles_post_ra>
// kernel: tpu_custom_call.1
= control target key start
LH: loop header
LB: loop body
LE: loop exit
PB: predicated region body
PF: predicated region fallthrough
CT: control target
= control target key end

     0   :  { %s1061_s14 = smov 126   ;;  %s1062_s15 = smov 127   ;;  %v1063_v2 = vmov 0.0   ;;  %s1240_s0 = inlined_call_operand.vmem [shape: f32[6,256], index: 0, kind: input, shape index: {}]   ;;  %s1241_s1 = inlined_call_operand.vmem [shape: f32[9,12,6], index: 1, kind: input, shape index: {}]   ;;  %s1242_s2 = inlined_call_operand.vmem [shape: f32[12,1], index: 2, kind: input, shape index: {}]   ;;  %s1243_s3 = inlined_call_operand.hbm [shape: f32[12,224], index: 3, kind: output, shape index: {}]  }
   0x1   :  { %v1097_v0 = vld [vmem:[%s1240_s0] sm:$0x3f]  ;;  %v16_v1 = vld [vmem:[%s1240_s0 + $0x8] sm:$0x3f]  ;;  %115 = vmatprep.mubr.f32.mxu1 %v1063_v2  ;;  %109 = vmatprep.mubr.f32.mxu0 %v1063_v2 }
   0x2   :  { %211 = vrot.lane.b32.xlu1 %v1097_v0, %s1061_s14  ;;  %19 = vrot.lane.b32.xlu0 %v1097_v0, %s1062_s15 }
   0x6   :  { %213 = vrot.lane.b32.xlu1 %v16_v1, %s1061_s14  ;;  %21 = vrot.lane.b32.xlu0 %v16_v1, %s1062_s15 }
   0x7   :  { %8 = vsyncpa [#allocation3], 0  ;;  %s1064_s18 = smov 112   ;;  %s1065_s19 = smov 111   ;;  %v1070_v3 = vmov 0   ;;  %v932_v4 = vld [vmem:[%s1242_s2] sm:$0xff]  ;;  %v23_v6 = vlaneseq }
   0x8   :  { %s1066_s20 = smov 110   ;;  %s1067_s0 = smov 96   ;;  %1037 = vset.pattern.permute.xlu0 %v1070_v3  ;;  %1038 = vset.pattern.permute.xlu1 %v1070_v3  ;;  %v933_v5 = vld [vmem:[%s1242_s2 + $0x8] sm:$0xf]  ;;  %vm38_vm2 = vcmask 1045504   ;;  %vm31_vm3 = vcmask 48128  }
   0x9   :  { %s1068_s21 = smov 95   ;;  %s1069_s22 = smov 94   ;;  %v1118_v7 = vand.u32 127, %v23_v6  ;;  %v971_v14 = vld [vmem:[%s1241_s1 + $0x18] sm:$0xf]  ;;  %v970_v16 = vld [vmem:[%s1241_s1 + $0x10] sm:$0xff] }
   0xa   :  { %316 = vrot.lane.b32.xlu1 %v16_v1, %s1064_s18  ;;  %314 = vrot.lane.b32.xlu0 %v1097_v0, %s1064_s18  ;;  %v17_v21 = vld [vmem:[%s1241_s1] sm:$0xff]  ;;  %v18_v28 = vld [vmem:[%s1241_s1 + $0x8] sm:$0xf]  ;;  %vm949_vm10 = vcmask 785408   ;;  %vm952_vm11 = vcmask 781312  }
   0xb   :  { %vm25_vm0 = vcmp.lt.s32.totalorder %v1118_v7, 127  ;;  %vm215_vm1 = vcmp.lt.s32.totalorder %v1118_v7, 126  ;;  %vm318_vm4 = vcmp.lt.s32.totalorder %v1118_v7, 112  ;;  %vm421_vm5 = vcmp.lt.s32.totalorder %v1118_v7, 111  ;;  %v980_v23 = vld [vmem:[%s1241_s1 + $0x20] sm:$0xff]  ;;  %v986_v33 = vld [vmem:[%s1241_s1 + $0x30] sm:$0xff] }
   0xc   :  { %vm524_vm6 = vcmp.lt.s32.totalorder %v1118_v7, 110  ;;  %v981_v29 = vld [vmem:[%s1241_s1 + $0x28] sm:$0xf]  ;;  %vm627_vm7 = vcmp.lt.s32.totalorder %v1118_v7, 96  ;;  %v992_v35 = vld [vmem:[%s1241_s1 + $0x40] sm:$0xff]  ;;  %vm730_vm8 = vcmp.lt.s32.totalorder %v1118_v7, 95 }
   0xd   :  { %v987_v40 = vld [vmem:[%s1241_s1 + $0x38] sm:$0xf]  ;;  %v993_v41 = vld [vmem:[%s1241_s1 + $0x48] sm:$0xf]  ;;  %v998_v45 = vld [vmem:[%s1241_s1 + $0x50] sm:$0xff]  ;;  %vm833_vm9 = vcmp.lt.s32.totalorder %v1118_v7, 94 }
   0xe   :  { %419 = vrot.lane.b32.xlu1 %v16_v1, %s1065_s19  ;;  %417 = vrot.lane.b32.xlu0 %v1097_v0, %s1065_s19  ;;  %v1004_v47 = vld [vmem:[%s1241_s1 + $0x60] sm:$0xff]  ;;  %v999_v52 = vld [vmem:[%s1241_s1 + $0x58] sm:$0xf] }
   0xf   :  { %v1005_v53 = vld [vmem:[%s1241_s1 + $0x68] sm:$0xf]  ;;  %v1010_v54 = vld [vmem:[%s1241_s1 + $0x70] sm:$0xff]  ;;  %v1016_v55 = vld [vmem:[%s1241_s1 + $0x80] sm:$0xff] }
  0x10   :  { %v1011_v56 = vld [vmem:[%s1241_s1 + $0x78] sm:$0xf]  ;;  %v1017_v57 = vld [vmem:[%s1241_s1 + $0x88] sm:$0xf]  ;;  %s1071_s1 = smov [#allocation2]  }
  0x11   :  { %s959_s6 = sshll.u32 %s1071_s1, 4  ;;  %s960_s6 = int_to_ptr.vmem [resolvable:$true] %s959_s6 }
  0x12   :  { %522 = vrot.lane.b32.xlu1 %v16_v1, %s1066_s20  ;;  %520 = vrot.lane.b32.xlu0 %v1097_v0, %s1066_s20  ;;  %s1039_s7 = scalar_lea.vmem %s960_s6, 512  ;;  %p1044_p1 = scmp.lt.s32.totalorder %s960_s6, %s960_s6 }
  0x13   :  { %p1040_p0 = scmp.ne.s32.totalorder %s960_s6, %s1039_s7  ;;  %p1045_p2 = scmp.lt.s32.totalorder %s1039_s7, %s1039_s7 }
  0x15   :  { %p1046_p3 = por %p1045_p2, %p1044_p1 }
  0x16   :  { %625 = vrot.lane.b32.xlu1 %v16_v1, %s1067_s0  ;;  %623 = vrot.lane.b32.xlu0 %v1097_v0, %s1067_s0 }
  0x17   :  { %p1047_p4 = pnand %p1046_p3, %p1040_p0 }
  0x1a   :  { %728 = vrot.lane.b32.xlu1 %v16_v1, %s1068_s21  ;;  %726 = vrot.lane.b32.xlu0 %v1097_v0, %s1068_s21 }
  0x1e   :  { %831 = vrot.lane.b32.xlu1 %v16_v1, %s1069_s22  ;;  %829 = vrot.lane.b32.xlu0 %v1097_v0, %s1069_s22 }
  0x22   :  { %936 = vperm.xlu0 %1037, %v932_v4   ;;  %941 = vperm.xlu1 %1038, %v933_v5  }
  0x74   :  { %v212_v8 = vpop.permute.xlu1 %211  ;;  %v20_v9 = vpop.permute.xlu0 %19 }
  0x78   :  { %v214_v10 = vpop.permute.xlu1 %213  ;;  %v22_v11 = vpop.permute.xlu0 %21 }
  0x79   :  { %v27_v12 = vsel %vm25_vm0, %v22_v11, %v20_v9  ;;  %v26_v13 = vsel %vm25_vm0, %v20_v9, %v22_v11  ;;  %v217_v15 = vsel %vm215_vm1, %v214_v10, %v212_v8  ;;  %v216_v17 = vsel %vm215_vm1, %v212_v8, %v214_v10 }
  0x7a   :  { %972 = vmatprep.subr.msk.mxu0 %vm38_vm2, %v27_v12  ;;  %1022 = vmatprep.subr.msk.mxu1 %vm38_vm2, %v27_v12 }
  0x7b   :  { %973 = vmatpush1.msk.msra.mxu0 %vm38_vm2, %v26_v13  ;;  %1023 = vmatpush1.msk.msra.mxu1 %vm38_vm2, %v26_v13 }
  0x7c   :  { %v317_v18 = vpop.permute.xlu1 %316  ;;  %975 = vmatmul.mubr.msk.f32.vlgmr.msra.gmra.mxu1 %vm31_vm3, %v971_v14  ;;  %976 = vmatprep.subr.msk.mxu1 %vm38_vm2, %v16_v1  ;;  %v315_v19 = vpop.permute.xlu0 %314 }
  0x7d   :  { %982 = vmatprep.subr.msk.mxu0 %vm38_vm2, %v217_v15  ;;  %v320_v20 = vsel %vm318_vm4, %v317_v18, %v315_v19  ;;  %974 = vmatmul.mubr.msk.f32.vlgmr.msra.gmra.mxu0 %vm31_vm3, %v970_v16  ;;  %v319_v22 = vsel %vm318_vm4, %v315_v19, %v317_v18 }
  0x7e   :  { %977 = vmatpush1.msk.msra.mxu1 %vm38_vm2, %v1097_v0  ;;  %983 = vmatpush1.msk.msra.mxu0 %vm38_vm2, %v216_v17 }
  0x7f   :  { %988 = vmatprep.subr.msk.mxu1 %vm38_vm2, %v320_v20  ;;  %198 = vmatprep.mubr.f32.mxu1 %v1063_v2 }
  0x80   :  { %v420_v24 = vpop.permute.xlu1 %419  ;;  %978 = vmatmul.mubr.msk.f32.vlgmr.msra.gmra.mxu1 %vm31_vm3, %v17_v21  ;;  %297 = vmatprep.mubr.f32.mxu0 %v1063_v2  ;;  %v418_v25 = vpop.permute.xlu0 %417 }
  0x81   :  { %989 = vmatpush1.msk.msra.mxu1 %vm38_vm2, %v319_v22  ;;  %v422_v26 = vsel %vm421_vm5, %v418_v25, %v420_v24  ;;  %v423_v27 = vsel %vm421_vm5, %v420_v24, %v418_v25  ;;  %984 = vmatmul.mubr.msk.f32.vlgmr.msra.gmra.mxu0 %vm31_vm3, %v980_v23 }
  0x82   :  { %994 = vmatprep.subr.msk.mxu0 %vm38_vm2, %v423_v27  ;;  %204 = vmatprep.mubr.f32.mxu1 %v1063_v2 }
  0x83   :  { %995 = vmatpush1.msk.msra.mxu0 %vm38_vm2, %v422_v26  ;;  %303 = vmatprep.mubr.f32.mxu0 %v1063_v2 }
  0x84   :  { %v523_v30 = vpop.permute.xlu1 %522  ;;  %979 = vmatmul.mubr.msk.f32.gmra.mxu1 %vm31_vm3, %v18_v28  ;;  %v521_v31 = vpop.permute.xlu0 %520 }
  0x85   :  { %v526_v32 = vsel %vm524_vm6, %v523_v30, %v521_v31  ;;  %985 = vmatmul.mubr.msk.f32.gmra.mxu0 %vm31_vm3, %v981_v29  ;;  %400 = vmatprep.mubr.f32.mxu1 %v1063_v2  ;;  %v525_v34 = vsel %vm524_vm6, %v521_v31, %v523_v30 }
  0x86   :  { %1000 = vmatprep.subr.msk.mxu1 %vm38_vm2, %v526_v32  ;;  %503 = vmatprep.mubr.f32.mxu0 %v1063_v2 }
  0x88   :  { %v626_v36 = vpop.permute.xlu1 %625  ;;  %990 = vmatmul.mubr.msk.f32.vlgmr.msra.gmra.mxu1 %vm31_vm3, %v986_v33  ;;  %v624_v37 = vpop.permute.xlu0 %623 }
  0x89   :  { %1001 = vmatpush1.msk.msra.mxu1 %vm38_vm2, %v525_v34  ;;  %v628_v38 = vsel %vm627_vm7, %v624_v37, %v626_v36  ;;  %v629_v39 = vsel %vm627_vm7, %v626_v36, %v624_v37  ;;  %996 = vmatmul.mubr.msk.f32.vlgmr.msra.gmra.mxu0 %vm31_vm3, %v992_v35 }
  0x8a   :  { %1006 = vmatprep.subr.msk.mxu0 %vm38_vm2, %v629_v39  ;;  %406 = vmatprep.mubr.f32.mxu1 %v1063_v2 }
  0x8b   :  { %1007 = vmatpush1.msk.msra.mxu0 %vm38_vm2, %v628_v38  ;;  %509 = vmatprep.mubr.f32.mxu0 %v1063_v2 }
  0x8c   :  { %v729_v42 = vpop.permute.xlu1 %728  ;;  %991 = vmatmul.mubr.msk.f32.gmra.mxu1 %vm31_vm3, %v987_v40  ;;  %v727_v43 = vpop.permute.xlu0 %726 }
  0x8d   :  { %v732_v44 = vsel %vm730_vm8, %v729_v42, %v727_v43  ;;  %997 = vmatmul.mubr.msk.f32.gmra.mxu0 %vm31_vm3, %v993_v41  ;;  %606 = vmatprep.mubr.f32.mxu1 %v1063_v2  ;;  %v731_v46 = vsel %vm730_vm8, %v727_v43, %v729_v42 }
  0x8e   :  { %1012 = vmatprep.subr.msk.mxu1 %vm38_vm2, %v732_v44  ;;  %709 = vmatprep.mubr.f32.mxu0 %v1063_v2 }
  0x90   :  { %v832_v48 = vpop.permute.xlu1 %831  ;;  %1002 = vmatmul.mubr.msk.f32.vlgmr.msra.gmra.mxu1 %vm31_vm3, %v998_v45  ;;  %v830_v49 = vpop.permute.xlu0 %829 }
  0x91   :  { %1013 = vmatpush1.msk.msra.mxu1 %vm38_vm2, %v731_v46  ;;  %v834_v50 = vsel %vm833_vm9, %v830_v49, %v832_v48  ;;  %v835_v51 = vsel %vm833_vm9, %v832_v48, %v830_v49  ;;  %1008 = vmatmul.mubr.msk.f32.vlgmr.msra.gmra.mxu0 %vm31_vm3, %v1004_v47 }
  0x92   :  { %1018 = vmatprep.subr.msk.mxu0 %vm38_vm2, %v835_v51  ;;  %612 = vmatprep.mubr.f32.mxu1 %v1063_v2 }
  0x93   :  { %1019 = vmatpush1.msk.msra.mxu0 %vm38_vm2, %v834_v50  ;;  %715 = vmatprep.mubr.f32.mxu0 %v1063_v2 }
  0x94   :  { %1003 = vmatmul.mubr.msk.f32.gmra.mxu1 %vm31_vm3, %v999_v52 }
  0x95   :  { %1009 = vmatmul.mubr.msk.f32.gmra.mxu0 %vm31_vm3, %v1005_v53  ;;  %812 = vmatprep.mubr.f32.mxu1 %v1063_v2 }
  0x96   :  { %915 = vmatprep.mubr.f32.mxu0 %v1063_v2 }
  0x98   :  { %1014 = vmatmul.mubr.msk.f32.vlgmr.msra.gmra.mxu1 %vm31_vm3, %v1010_v54 }
  0x99   :  { %1020 = vmatmul.mubr.msk.f32.vlgmr.msra.gmra.mxu0 %vm31_vm3, %v1016_v55  ;;  %818 = vmatprep.mubr.f32.mxu1 %v1063_v2 }
  0x9a   :  { %921 = vmatprep.mubr.f32.mxu0 %v1063_v2 }
  0x9c   :  { %1015 = vmatmul.mubr.msk.f32.gmra.mxu1 %vm31_vm3, %v1011_v56 }
  0x9d   :  { %1021 = vmatmul.mubr.msk.f32.gmra.mxu0 %vm31_vm3, %v1017_v57  ;;  %v937_v48 = vpop.permute.xlu0 %936 }
 0x13c   :  { %v117_v58 = vpop.f32.mrf.mxu1 }
 0x13d   :  { %v111_v59 = vpop.f32.mrf.mxu0 }
 0x13e   :  { %v119_v60 = vpop.f32.mrf.mxu1 }
 0x13f   :  { %v113_v61 = vpop.f32.mrf.mxu0 }
 0x140   :  { %v200_v62 = vpop.f32.mrf.mxu1 }
 0x141   :  { %v299_v63 = vpop.f32.mrf.mxu0  ;;  %v201_v2 = vadd.f32 %v200_v62, %v111_v59 }
 0x142   :  { %v202_v0 = vpop.f32.mrf.mxu1 }
 0x143   :  { %v301_v1 = vpop.f32.mrf.mxu0  ;;  %v203_v8 = vadd.f32 %v202_v0, %v113_v61  ;;  %v310_v11 = vadd.f32 %v299_v63, %v201_v2 }
 0x144   :  { %v206_v3 = vpop.f32.mrf.mxu1 }
 0x145   :  { %v305_v4 = vpop.f32.mrf.mxu0  ;;  %v207_v12 = vadd.f32 %v206_v3, %v117_v58  ;;  %v311_v15 = vadd.f32 %v301_v1, %v203_v8 }
 0x146   :  { %v208_v5 = vpop.f32.mrf.mxu1 }
 0x147   :  { %v307_v6 = vpop.f32.mrf.mxu0  ;;  %v209_v16 = vadd.f32 %v208_v5, %v119_v60  ;;  %v312_v20 = vadd.f32 %v305_v4, %v207_v12  ;;  %v942_v60 = vpop.permute.xlu1 %941 }
 0x148   :  { %v402_v7 = vpop.f32.mrf.mxu1 }
 0x149   :  { %v505_v9 = vpop.f32.mrf.mxu0  ;;  %v413_v17 = vadd.f32 %v402_v7, %v310_v11  ;;  %v313_v24 = vadd.f32 %v307_v6, %v209_v16 }
 0x14a   :  { %v404_v10 = vpop.f32.mrf.mxu1 }
 0x14b   :  { %v507_v13 = vpop.f32.mrf.mxu0  ;;  %v414_v21 = vadd.f32 %v404_v10, %v311_v15  ;;  %v516_v25 = vadd.f32 %v505_v9, %v413_v17 }
 0x14c   :  { %v408_v14 = vpop.f32.mrf.mxu1 }
 0x14d   :  { %v511_v18 = vpop.f32.mrf.mxu0  ;;  %v415_v26 = vadd.f32 %v408_v14, %v312_v20  ;;  %v517_v29 = vadd.f32 %v507_v13, %v414_v21 }
 0x14e   :  { %v410_v19 = vpop.f32.mrf.mxu1 }
 0x14f   :  { %v513_v22 = vpop.f32.mrf.mxu0  ;;  %v416_v30 = vadd.f32 %v410_v19, %v313_v24  ;;  %v518_v34 = vadd.f32 %v511_v18, %v415_v26 }
 0x150   :  { %v608_v23 = vpop.f32.mrf.mxu1 }
 0x151   :  { %v711_v27 = vpop.f32.mrf.mxu0  ;;  %v619_v31 = vadd.f32 %v608_v23, %v516_v25  ;;  %v519_v38 = vadd.f32 %v513_v22, %v416_v30 }
 0x152   :  { %v610_v28 = vpop.f32.mrf.mxu1 }
 0x153   :  { %v713_v32 = vpop.f32.mrf.mxu0  ;;  %v620_v35 = vadd.f32 %v610_v28, %v517_v29  ;;  %v722_v39 = vadd.f32 %v711_v27, %v619_v31 }
 0x154   :  { %v614_v33 = vpop.f32.mrf.mxu1 }
 0x155   :  { %v717_v36 = vpop.f32.mrf.mxu0  ;;  %v621_v40 = vadd.f32 %v614_v33, %v518_v34  ;;  %v723_v43 = vadd.f32 %v713_v32, %v620_v35 }
 0x156   :  { %v616_v37 = vpop.f32.mrf.mxu1 }
 0x157   :  { %v719_v41 = vpop.f32.mrf.mxu0  ;;  %v622_v44 = vadd.f32 %v616_v37, %v519_v38  ;;  %v724_v49 = vadd.f32 %v717_v36, %v621_v40 }
 0x158   :  { %v814_v42 = vpop.f32.mrf.mxu1 }
 0x159   :  { %v825_v45 = vadd.f32 %v814_v42, %v722_v39  ;;  %v917_v46 = vpop.f32.mrf.mxu0  ;;  %v725_v54 = vadd.f32 %v719_v41, %v622_v44 }
 0x15a   :  { %v816_v47 = vpop.f32.mrf.mxu1 }
 0x15b   :  { %v928_v50 = vadd.f32 %v917_v46, %v825_v45  ;;  %v826_v51 = vadd.f32 %v816_v47, %v723_v43  ;;  %v919_v52 = vpop.f32.mrf.mxu0 }
 0x15c   :  { %v820_v53 = vpop.f32.mrf.mxu1 }
 0x15d   :  { %v929_v55 = vadd.f32 %v919_v52, %v826_v51  ;;  %v827_v56 = vadd.f32 %v820_v53, %v724_v49  ;;  %v944_v57 = vadd.f32 %v937_v48, %v928_v50  ;;  %v923_v58 = vpop.f32.mrf.mxu0 }
 0x15e   :  { %v822_v59 = vpop.f32.mrf.mxu1 }
 0x15f   :  { %v945_v61 = vadd.f32 %v937_v48, %v929_v55  ;;  %948 = vst [vmem:[#allocation2] sm:$0xff] %v944_v57  ;;  %v930_v62 = vadd.f32 %v923_v58, %v827_v56  ;;  %v828_v63 = vadd.f32 %v822_v59, %v725_v54  ;;  %v925_v0 = vpop.f32.mrf.mxu0 }
 0x161   :  { %950 = vst.msk [vmem:[#allocation2 + $0x8] sm:$0xff] %vm949_vm10, %v945_v61  ;;  %v931_v1 = vadd.f32 %v925_v0, %v828_v63  ;;  %v946_v3 = vadd.f32 %v942_v60, %v930_v62 }
 0x163   :  { %v947_v4 = vadd.f32 %v942_v60, %v931_v1  ;;  %951 = vst [vmem:[#allocation2 + $0x10] sm:$0xf] %v946_v3 }
 0x165   :  { %953 = vst.msk [vmem:[#allocation2 + $0x18] sm:$0xf] %vm952_vm11, %v947_v4 }
 0x166   :  { %1050 = shalt.err (!%p1047_p4)
}
 0x167   :  { %s1072_s8 = smov 256   ;;  %s1073_s9 = smov 16  }
 0x168   :  { %965 = dma.vmem_to_hbm [thread:$0]  %s960_s6, 512, %s1243_s3, [#allocation3], %s1072_s8, %s1072_s8, %s1073_s9  }
 0x169   :  { %1059 = dma.done.wait [#allocation3], 512  }
 0x16a   :  { %1060 = vsyncadd [#allocation3], 4294966784 }
 0x16b   :  { %969 = vsyncpa [#allocation3], 1 }

</bundles_post_ra>
